<compile_context>
chip_gen: v5e
topology: v5e:2x2
jax: 0.10.0
libtpu: 0.0.40
codegen_flags: <defaults>
</compile_context>

<pallas_src>
import jax
import jax.numpy as jnp
from jax.experimental import pallas as pl
from jax.experimental.pallas import tpu as pltpu


def _patch_embed_kernel(x_ref, w_ref, pos_ref, o_ref):
    # x_ref:   (BM, P)  block of BM = TB*N flattened (batch*seq) rows (bf16/f32)
    # w_ref:   (P, E)   pre-transposed weight, VMEM-resident across the grid
    # pos_ref: (BM, E)  pos-encoding with Linear bias pre-folded, tiled to BM rows, f32
    # o_ref:   (BM, E)
    y = jnp.dot(x_ref[...], w_ref[...], preferred_element_type=jnp.float32)
    o_ref[...] = (y + pos_ref[...]).astype(o_ref.dtype)


def _pick_batch_block(batch, n, *, target_rows=512, min_steps=4):
    """Pick TB (batches per grid step) so that:
       * the grid has at least min(batch, min_steps) steps (keeps both v7x
         TensorCores fed and the DMA/compute pipeline primed),
       * rows per step (TB*n) is <= ~target_rows,
       * the block's second-to-last dim (TB*n) is sublane-aligned (multiple of 8)
         whenever possible.
    """
    steps_wanted = max(1, min(batch, min_steps))
    tb_cap = max(1, batch // steps_wanted)
    tb = max(1, min(tb_cap, max(1, target_rows // max(n, 1))))
    while tb > 1 and (tb * n) % 8 != 0:
        tb -= 1
    if (tb * n) % 8 != 0:
        # Fall back to one full block (block == full array rows is always legal).
        tb = batch
    return tb


def patch_embedder(x, weight_t, pos_plus_bias, *, out_dtype=None):
    """x: (B, N, P); weight_t: (P, E) [nn.Linear weight pre-transposed at init];
    pos_plus_bias: (>=N, E) positional table with the Linear bias pre-folded in."""
    B, N, P = x.shape
    P_w, E = weight_t.shape
    if P_w != P:
        raise ValueError(f"weight_t K dim {P_w} != patch dim {P}")
    if N > pos_plus_bias.shape[0]:
        raise ValueError(
            f"sequence length {N} exceeds positional table rows {pos_plus_bias.shape[0]}")
    out_dtype = x.dtype if out_dtype is None else out_dtype

    TB = _pick_batch_block(B, N)
    B_pad = pl.cdiv(B, TB) * TB
    steps = B_pad // TB
    BM = TB * N                       # rows per grid step

    # Flatten (B, N) -> (B*N): contiguous reshape, free in HBM.
    x_flat = x.reshape(B * N, P)
    if B_pad != B:
        # Pad ragged batches so every grid step gets a full BM-row block.
        x_flat = jnp.pad(x_flat, ((0, (B_pad - B) * N), (0, 0)))

    # Positional table tiled to the block rows (bias already folded in).  This is a
    # tiny parameter-sized op outside the kernel; it is DMA'd into VMEM once.
    pos_block = jnp.tile(pos_plus_bias[:N].astype(jnp.float32), (TB, 1))

    itemsize_out = jnp.dtype(out_dtype).itemsize
    cost = pl.CostEstimate(
        flops=2 * B_pad * N * P * E,
        transcendentals=0,
        bytes_accessed=(x_flat.size * x_flat.dtype.itemsize
                        + weight_t.size * weight_t.dtype.itemsize
                        + pos_block.size * pos_block.dtype.itemsize
                        + B_pad * N * E * itemsize_out),
    )

    # Explicit VMEM budget: double-buffered streamed blocks + (conservatively
    # double-buffered) resident weight/pos, with headroom; clamped so it is valid
    # on every chip generation (>= default scoped limit, <= v7x physical 64 MiB).
    x_block_b = BM * P * x_flat.dtype.itemsize
    o_block_b = BM * E * itemsize_out
    w_b = P * E * weight_t.dtype.itemsize
    pos_b = BM * E * 4
    footprint = 2 * (x_block_b + o_block_b) + 2 * (w_b + pos_b)
    vmem_limit = max(32 << 20, min(64 << 20, 2 * footprint + (4 << 20)))

    out_flat = pl.pallas_call(
        _patch_embed_kernel,
        out_shape=jax.ShapeDtypeStruct((B_pad * N, E), out_dtype),
        grid_spec=pltpu.PrefetchScalarGridSpec(
            num_scalar_prefetch=0,
            grid=(steps,),
            in_specs=[
                pl.BlockSpec((BM, P), lambda i: (i, 0)),   # x rows: BM per step
                pl.BlockSpec((P, E), lambda i: (0, 0)),    # weight: VMEM-resident
                pl.BlockSpec((BM, E), lambda i: (0, 0)),   # pos+bias: VMEM-resident
            ],
            out_specs=pl.BlockSpec((BM, E), lambda i: (i, 0)),
        ),
        compiler_params=pltpu.CompilerParams(
            dimension_semantics=("parallel",),   # shard batch blocks across TensorCores
            vmem_limit_bytes=int(vmem_limit),
        ),
        cost_estimate=cost,
    )(x_flat, weight_t, pos_block)

    return out_flat[: B * N].reshape(B, N, E)


if __name__ == "__main__":
    # Small shapes consistent with the module; E chosen lane-dense (multiple of 128).
    B, N, P, E = 2, 8, 16, 128

    key = jax.random.PRNGKey(0)
    kx, kw, kb, kp = jax.random.split(key, 4)

    # MXU operands in bf16 (halves HBM traffic, doubles MXU rate); accumulation in f32.
    x = jax.random.normal(kx, (B, N, P), dtype=jnp.float32).astype(jnp.bfloat16)
    weight = (jax.random.normal(kw, (E, P), dtype=jnp.float32)
              / jnp.sqrt(P)).astype(jnp.bfloat16)                 # nn.Linear weight (E, P)
    bias = jax.random.normal(kb, (E,), dtype=jnp.float32) * 0.01  # nn.Linear bias (E,)
    pos_enc = jax.random.normal(kp, (1, 196, E), dtype=jnp.float32)

    # Init-time parameter prep (done ONCE, off the per-call hot path):
    weight_t = weight.T                               # (P, E): MXU-native RHS layout
    pos_plus_bias = pos_enc[0] + bias[None, :]        # (196, E), f32, bias folded in

    out = patch_embedder(x, weight_t, pos_plus_bias)  # bf16 out (default = x.dtype)
    out = jax.block_until_ready(out)

    # Plain-JAX reference (same bf16 operands, f32 math, then cast like the kernel).
    ref_f32 = (jnp.einsum("bnp,pe->bne",
                          x.astype(jnp.float32), weight_t.astype(jnp.float32))
               + pos_plus_bias[None, :N, :])

    assert out.shape == (B, N, E)
    assert out.dtype == x.dtype
    err = float(jnp.max(jnp.abs(out.astype(jnp.float32) - ref_f32)))
    assert jnp.allclose(out.astype(jnp.float32), ref_f32, atol=5e-2, rtol=5e-2), err
    print("KERNEL_OK")
</pallas_src>

<mosaic_0001>
module attributes {stable_mosaic.version = 11 : i64} {
  func.func @_patch_embed_kernel(%arg0: i32, %arg1: memref<8x16xbf16, #tpu.memory_space<vmem>>, %arg2: memref<16x128xbf16, #tpu.memory_space<vmem>>, %arg3: memref<8x128xf32, #tpu.memory_space<vmem>>, %arg4: memref<8x128xbf16, #tpu.memory_space<vmem>>) attributes {dimension_semantics = [#tpu.dimension_semantics<parallel>], iteration_bounds = array<i64: 2>, scalar_prefetch = 0 : i64, scratch_operands = 0 : i64, tpu.core_type = #tpu.core_type<tc>, window_params = [{transform_indices = @transform_0, window_bounds = array<i64: 8, 16>}, {pipeline_mode = #tpu.pipeline_mode<synchronous>, transform_indices = @transform_1, window_bounds = array<i64: 16, 128>}, {pipeline_mode = #tpu.pipeline_mode<synchronous>, transform_indices = @transform_2, window_bounds = array<i64: 8, 128>}, {transform_indices = @transform_3, window_bounds = array<i64: 8, 128>}]} {
    %c0 = arith.constant 0 : index
    %c0_0 = arith.constant 0 : index
    %0 = vector.load %arg1[%c0, %c0_0] : memref<8x16xbf16, #tpu.memory_space<vmem>>, vector<8x16xbf16>
    %c0_1 = arith.constant 0 : index
    %c0_2 = arith.constant 0 : index
    %1 = vector.load %arg2[%c0_1, %c0_2] : memref<16x128xbf16, #tpu.memory_space<vmem>>, vector<16x128xbf16>
    %cst = arith.constant dense<0.000000e+00> : vector<8x128xf32>
    %2 = tpu.matmul %0, %1, %cst {dimension_numbers = #tpu.dot_dimension_numbers<[1], [0], [0], [1], [0, 0, 1, 1], [], []>} : vector<8x16xbf16>, vector<16x128xbf16>, vector<8x128xf32> -> vector<8x128xf32>
    %c0_3 = arith.constant 0 : index
    %c0_4 = arith.constant 0 : index
    %3 = vector.load %arg3[%c0_3, %c0_4] : memref<8x128xf32, #tpu.memory_space<vmem>>, vector<8x128xf32>
    %4 = arith.addf %2, %3 : vector<8x128xf32>
    %5 = arith.truncf %4 : vector<8x128xf32> to vector<8x128xbf16>
    %c0_5 = arith.constant 0 : index
    %c0_6 = arith.constant 0 : index
    %6 = vector.load %arg4[%c0_5, %c0_6] : memref<8x128xbf16, #tpu.memory_space<vmem>>, vector<8x128xbf16>
    tpu.vector_store %arg4[%c0_5, %c0_6], %5 {strides = array<i32>} : memref<8x128xbf16, #tpu.memory_space<vmem>>, vector<8x128xbf16>,
    return
  }
  func.func @transform_0(%arg0: i32) -> (i32, i32) {
    %c0_i32 = arith.constant 0 : i32
    %c0_i32_0 = arith.constant 0 : i32
    return %arg0, %c0_i32 : i32, i32
  }
  func.func @transform_1(%arg0: i32) -> (i32, i32) {
    %c0_i32 = arith.constant 0 : i32
    %c0_i32_0 = arith.constant 0 : i32
    %c0_i32_1 = arith.constant 0 : i32
    return %c0_i32, %c0_i32_0 : i32, i32
  }
  func.func @transform_2(%arg0: i32) -> (i32, i32) {
    %c0_i32 = arith.constant 0 : i32
    %c0_i32_0 = arith.constant 0 : i32
    %c0_i32_1 = arith.constant 0 : i32
    return %c0_i32, %c0_i32_0 : i32, i32
  }
  func.func @transform_3(%arg0: i32) -> (i32, i32) {
    %c0_i32 = arith.constant 0 : i32
    %c0_i32_0 = arith.constant 0 : i32
    return %arg0, %c0_i32 : i32, i32
  }
}

</mosaic_0001>

<bundles_post_ra>
// kernel: tpu_custom_call.1
= control target key start
LH: loop header
LB: loop body
LE: loop exit
PB: predicated region body
PF: predicated region fallthrough
CT: control target
= control target key end

     0   :  { %8 = vsyncpa [#allocation3], 0  ;;  %s776_s0 = inlined_call_operand.hbm [shape: bf16[16,16], index: 0, kind: input, shape index: {}]   ;;  %s777_s1 = inlined_call_operand.hbm [shape: bf16[16,128], index: 1, kind: input, shape index: {}]   ;;  %s778_s2 = inlined_call_operand.hbm [shape: f32[8,128], index: 2, kind: input, shape index: {}]   ;;  %s779_s3 = inlined_call_operand.hbm [shape: bf16[16,128], index: 3, kind: output, shape index: {}]  }
   0x1   :  { %10 = vsyncpa [#allocation3 + $0x1], 0 }
   0x2   :  { %11 = vsyncpa [#allocation6], 0 }
   0x3   :  { %12 = vsyncpa [#allocation4], 0 }
   0x4   :  { %14 = vsyncpa [#allocation4 + $0x1], 0  ;;  %s631_s12 = smov 0   ;;  %s633_s13 = smov 0  }
   0x5   :  { %s635_s14 = smov 0   ;;  %s637_s15 = smov 0  }
   0x6 LB: > { %s130_s18 = sshll.u32 %s777_s1, 4  ;;  %s655_s19 = sadd.s32 4294967295, %s605_s15   ;;  %s605_s15 = sphi %s637_s15, %s790_s15   ;;  %s601_s14 = sphi %s635_s14, %s789_s14   ;;  %s597_s13 = sphi %s633_s13, %s788_s13   ;;  %s593_s12 = sphi %s631_s12, %s787_s12   ;;  %s131_s18 = int_to_ptr.hbm [resolvable:$true] %s130_s18 }
   0x7   : > { %p355_p0 = scmp.ge.s32.totalorder %s605_s15, 1  ;;  %p41_p1 = scmp.eq.s32.totalorder %s655_s19, 0 }
   0x8   : > { %p119_p2 = scmp.lt.s32.totalorder %s605_s15, 3  ;;  %s607_s21 = smov [#allocation5]  }
   0x9   : > { %s132_s22 = sshll.u32 %s607_s21, 4  ;;  %s145_s25 = sshll.u32 %s778_s2, 4  ;;  %s133_s22 = int_to_ptr.vmem [resolvable:$true] %s132_s22  ;;  %s146_s25 = int_to_ptr.hbm [resolvable:$true] %s145_s25 }
   0xa   : > { %p660_p3 = pnand %p355_p0, %p119_p2  ;;  %s608_s26 = smov [#allocation7]  }
   0xb   : > { %s147_s27 = sshll.u32 %s608_s26, 4  ;;  %s609_s28 = smov 64   ;;  %s148_s27 = int_to_ptr.vmem [resolvable:$true] %s147_s27 }
   0xc   : > { %p388_p4 = pneg %p660_p3  ;;  %s610_s29 = smov 4  }
   0xd   : > { %s354_s30 = sadd.s32 4294967294, %s605_s15   ;;  %s674_s4 = sadd.s32 1, %s605_s15  }
   0xe   : > { %p389_p6 = pnand %p388_p4, %p41_p1  ;;  %s24_s5 = ssub.s32 %s605_s15, %s674_s4 }
   0xf   : > { %s27_s6 = sadd.s32 1, %s601_s14  ;;  %p25_p7 = scmp.eq.s32.totalorder %s24_s5, 0 }
  0x10   : > { %391 = dma.hbm_to_vmem [thread:$0]  (!%p389_p6), %s131_s18, 128, %s133_s22, [#allocation6], %s609_s28, %s609_s28, %s610_s29  }
  0x11   : > { %394 = dma.hbm_to_vmem [thread:$0]  (!%p389_p6), %s146_s25, 128, %s148_s27, [#allocation6]  }
  0x12   : > { %p34_p8 = scmp.ne.s32.totalorder %s601_s14, %s597_s13  ;;  %p35_p9 = scmp.eq.s32.totalorder %s605_s15, 0 }
  0x13   : > { %p40_p10 = scmp.ne.s32.totalorder %s597_s13, %s593_s12  ;;  %p106_p13 = scmp.eq.s32.totalorder %s655_s19, 1 }
  0x14   : > { %s685_s7 = scalar_select %p25_p7, %s601_s14, %s27_s6  }
  0x15   : > { %p687_p11 = por %p35_p9, %p34_p8  ;;  %p693_p12 = por %p41_p1, %p40_p10 }
  0x16   : > { %p112_p0 = scmp.eq.s32.totalorder %s354_s30, 1  ;;  %p405_p2 = scmp.lt.s32.totalorder %s605_s15, 2 }
  0x17   : > { %s158_s10 = sand.u32 1, %s601_s14   ;;  %p700_p4 = por %p106_p13, %p34_p8 }
  0x18   : > { %p704_p6 = por %p112_p0, %p40_p10  ;;  %s359_s17 = sshll.u32 %s158_s10, 2 }
  0x19   : > { %s360_s18 = sshll.u32 %s605_s15, 2  ;;  %s162_s24 = scalar_lea.vmem [#allocation2], %s359_s17 }
  0x1a   : > { %s166_s23 = scalar_lea.hbm %s776_s0, %s360_s18  ;;  %s170_s25 = sshll.u32 %s162_s24, 4  ;;  %s171_s25 = int_to_ptr.vmem [resolvable:$true] %s170_s25 }
  0x1b   : > { %s168_s26 = sshll.u32 %s166_s23, 4  ;;  %p714_p7 = pnand %p405_p2, %p687_p11  ;;  %s169_s26 = int_to_ptr.hbm [resolvable:$true] %s168_s26 }
  0x1c   : > { %s159_s28 = scalar_lea.sflag [#allocation3], %s158_s10  ;;  %s505_s29 = sshra.s32 %s169_s26, 4  ;;  %s506_s29 = int_to_ptr.hbm [resolvable:$true] %s505_s29 }
  0x1d   : > { %s507_s30 = scalar_lea.hbm %s506_s29, 4  ;;  %p509_p9 = pneg %p714_p7 }
  0x1e   : > { %p508_p8 = scmp.ne.s32.totalorder %s506_s29, %s507_s30  ;;  %s512_s17 = scalar_lea.hbm %s776_s0, 8 }
  0x1f   : > { %p513_p11 = scmp.lt.s32.totalorder %s506_s29, %s776_s0  ;;  %p514_p0 = scmp.lt.s32.totalorder %s512_s17, %s507_s30 }
  0x20   : > { %p510_p10 = pnand %p509_p9, %p508_p8 }
  0x21   : > { %p515_p2 = por %p514_p0, %p513_p11 }
  0x22   : > { %p511_p13 = pneg %p510_p10 }
  0x24   : > { %p516_p5 = pnand %p515_p2, %p511_p13 }
  0x26   : > { %519 = shalt.err (!%p516_p5)
}
  0x27   : > { %398 = dma.hbm_to_vmem [thread:$0]  (!%p714_p7), %s169_s26, 64, %s171_s25, %s159_s28  }
  0x28   : > { %179 = sbr.rel (%p660_p3) target bundleno = 186 (0xba), region = 32  ;;  %s731_s10 = sand.u32 (!%p660_p3), 1, %s597_s13  }
  0x29   : > { %s362_s21 = sshll.u32 (!%p660_p3), %s731_s10, 2  ;;  %s182_s22 = scalar_lea.sflag (!%p660_p3), [#allocation3], %s731_s10 }
  0x2a   : > { %s185_s23 = scalar_lea.vmem (!%p660_p3), [#allocation2], %s362_s21 }
  0x2d   : > { %580 = dma.done.wait (%p693_p12), %s182_s22, 64  }
  0x2e   : > { %582 = vsyncadd (%p693_p12), %s182_s22, 4294967232 }
  0x2f   : > { %584 = dma.done.wait (%p41_p1), [#allocation6], 256  }
  0x30   : > { %586 = vsyncadd (%p41_p1), [#allocation6], 4294967040  ;;  %v375_v0 = vld [vmem:[#allocation5] sm:$0xff]  ;;  %v220_v1 = vld [vmem:[%s185_s23] sm:$0xf]  ;;  %vm230_vm0 = vcmask 130048  }
  0x31   : > { %241 = vmatpush.bf16.msra.mxu0 %v375_v0  ;;  %s372_s20 = sshll.u32 %s655_s19, 2  ;;  %v223_v2 = vld [vmem:[#allocation7] sm:$0xff]  ;;  %s218_s9 = scalar_lea.vmem [#allocation8], %s362_s21 }
  0x32   : > { %s260_s26 = scalar_lea.hbm %s779_s3, %s372_s20  ;;  %s262_s27 = sshll.u32 %s218_s9, 4  ;;  %s263_s27 = int_to_ptr.vmem [resolvable:$true] %s262_s27 }
  0x33   : > { %s264_s28 = sshll.u32 %s260_s26, 4  ;;  %s250_s29 = scalar_lea.sflag [#allocation4], %s731_s10  ;;  %s265_s28 = int_to_ptr.hbm [resolvable:$true] %s264_s28 }
  0x34   : > { %370 = vmatmul.msk.bf16.vlgmr.msra.gmra.mxu0 %vm230_vm0, %v220_v1  ;;  %s549_s30 = sshra.s32 %s265_s28, 4  ;;  %s555_s17 = scalar_lea.hbm %s779_s3, 8  ;;  %s550_s30 = int_to_ptr.hbm [resolvable:$true] %s549_s30 }
  0x35   : > { %s551_s5 = scalar_lea.hbm %s550_s30, 4  ;;  %p556_p12 = scmp.lt.s32.totalorder %s550_s30, %s779_s3 }
  0x36   : > { %p552_p1 = scmp.ne.s32.totalorder %s550_s30, %s551_s5  ;;  %p557_p7 = scmp.lt.s32.totalorder %s555_s17, %s551_s5 }
  0x38   : > { %p553_p3 = pnand %p552_p1, %p700_p4  ;;  %p558_p8 = por %p557_p7, %p556_p12 }
  0x3a   : > { %p554_p5 = pneg %p553_p3 }
  0x3c   : > { %p559_p9 = pnand %p558_p8, %p554_p5 }
  0xb1   : > { %v243_v3 = vpop.f32.mrf.mxu0 }
  0xb2   : > { %v244_v4 = vadd.f32 %v243_v3, %v223_v2 }
  0xb4   : > { %v247_v5 = vpack.c.bf16 %v244_v4, %v244_v4 }
  0xb6   : > { %248 = vst [vmem:[%s218_s9] sm:$0xf] %v247_v5 }
  0xb7   : > { %562 = shalt.err (!%p559_p9)
}
  0xb8   : > { %386 = dma.vmem_to_hbm [thread:$0]  (%p700_p4), %s263_s27, 64, %s265_s28, %s250_s29  }
  0xb9   : > { %v245_v6 = vpop.f32.mrf.mxu0 }
  0xba PF: > { %s276_s10 = sand.u32 1, %s593_s12   ;;  %p786_p10 = scmp.ge.s32.totalorder %s605_s15, 2 }
  0xbb   : > { %s277_s21 = scalar_lea.sflag [#allocation4], %s276_s10 }
  0xbc   : > { %p400_p13 = pnand %p786_p10, %p704_p6 }
  0xbe   : > { %p401_p11 = pneg %p400_p13 }
  0xc0   : > { %588 = dma.done.wait (%p401_p11), %s277_s21, 64  }
  0xc1   : > { %590 = vsyncadd (%p401_p11), %s277_s21, 4294967232  ;;  %p17_p0 = scmp.ge.s32.totalorder %s674_s4, 4   ;;  %s787_s12 = smov %s597_s13 }
  0xc2   : > { %s788_s13 = smov %s601_s14  ;;  %s789_s14 = smov %s685_s7 }
  0xc3   : > { %s790_s15 = smov %s674_s4  ;;  %19 = sbr.rel (!%p17_p0) target bundleno = 6 (0x6), region = 85 }
  0xc8   :  { %283 = vsyncpa [#allocation3], 1 }
  0xc9   :  { %285 = vsyncpa [#allocation3 + $0x1], 1 }
  0xca   :  { %286 = vsyncpa [#allocation6], 1 }
  0xcb   :  { %287 = vsyncpa [#allocation4], 1 }
  0xcc   :  { %289 = vsyncpa [#allocation4 + $0x1], 1 }

</bundles_post_ra>
